<compile_context>
chip_gen: v6e
topology: v6e:2x2x1
jax: 0.10.0
libtpu: 0.0.40
codegen_flags: <defaults>
</compile_context>

<pallas_src>
import numpy as np
import jax
import jax.numpy as jnp
from jax import lax
from jax.experimental import pallas as pl
from jax.experimental.pallas import tpu as pltpu


def fused_conv_leaky_kernel(x_ref, wb_ref, g_ref, out_ref):
    """One fused pass:
         z   = x @ WB           (bias folded via ones-column in x)
                                cols 0:8 -> v1, 8:16 -> v2 center, 16:24 -> b2 per row
         l   = leaky(z)         == [v5 | leaky(v2_center) | leaky(b2) = v8 border value]
         out = l @ G            0/1 scatter -> lane-dense (Npad, 128) rows,
                                cols 0:72 are the (c, h, w)-ordered result

    x_ref:   (Npad, KE+1)   flattened conv1 receptive fields + trailing ones column
    wb_ref:  (KE+1, 3*C)    folded conv1/conv2 weights; last row is the bias row
    g_ref:   (3*C, 128)     constant scatter matrix (center/border placement), lane-padded
    out_ref: (Npad, 128)    final v5+v8 in cols 0:C*9, zeros elsewhere
    """
    z = jnp.dot(x_ref[...], wb_ref[...], preferred_element_type=jnp.float32)
    l = jnp.where(z > 0, z, z * -0.1)                          # leaky mix (VPU)
    out_ref[...] = jnp.dot(l, g_ref[...],
                           preferred_element_type=jnp.float32).astype(out_ref.dtype)


def prepare_params(w1, b1, w2, b2, H, W):
    """Fold the two convs + biases + output scatter into two small constant operands.

    Valid under the module's own constraint that conv1's output is 1x1 (H, W in {1,2}):
    only kernel taps (kh, kw) in [1, 1+H) x [1, 1+W) touch real pixels, so conv1 is a
    plain (Cin*H*W -> Cout) matmul; conv2 is 1x1 so it composes into the same matmul.
    """
    Cout, Cin = w1.shape[0], w1.shape[1]
    KE = Cin * H * W

    w1m = w1[:, :, 1:1 + H, 1:1 + W].reshape(Cout, KE).T          # (KE, C)
    w2m = w2.reshape(Cout, Cout).T                                 # (C, C)  (1x1 conv)

    #                v1 columns   v2-center columns              b2 passthrough columns
    Wmat = jnp.concatenate([w1m,  w1m @ w2m,                      jnp.zeros((KE, Cout), w1.dtype)],
                           axis=1)                                                  # (KE, 3C)
    Brow = jnp.concatenate([b1,   b1 @ w2m + b2,                  b2])[None, :]     # (1, 3C)
    wb = jnp.concatenate([Wmat, Brow], axis=0)                                      # (KE+1, 3C)

    # Scatter matrix: output row layout is (c, h, w) with 3x3 spatial, center index 4.
    #   leaky(v1)        -> all 9 positions of channel c
    #   leaky(v2_center) -> center only
    #   leaky(b2)        -> the 8 border positions (conv2 over zero padding = bias only)
    # Lane-padded to 128 columns so the kernel output store is unmasked.
    g = np.zeros((3 * Cout, 128), np.float32)
    for c in range(Cout):
        g[c, c * 9:(c + 1) * 9] = 1.0
        g[Cout + c, c * 9 + 4] = 1.0
        g[2 * Cout + c, c * 9:(c + 1) * 9] = 1.0
        g[2 * Cout + c, c * 9 + 4] = 0.0
    return wb, jnp.asarray(g)


@jax.jit
def model_forward(x, wb, g):
    """x: (N, Cin, H, W) float32 with H, W in {1, 2} (so conv1 output is 1x1)."""
    N, Cin, H, W = x.shape
    Cout = wb.shape[1] // 3
    OH1 = (H + 2 - 3) // 2 + 1
    OW1 = (W + 2 - 3) // 2 + 1
    assert OH1 == 1 and OW1 == 1, "v5+v8 broadcast requires conv1 output 1x1 (H,W<=2)"
    KE = Cin * H * W
    assert wb.shape == (KE + 1, 3 * Cout)
    assert g.shape == (3 * Cout, 128)

    patches = x.reshape(N, KE)                  # free bitcast (NCHW row-major)
    patches = jnp.concatenate(                  # ones column -> bias folded into the dot
        [patches, jnp.ones((N, 1), patches.dtype)], axis=1)            # (N, KE+1)
    npad = -(-N // 8) * 8                       # pad batch rows to sublane multiple
    if npad != N:
        patches = jnp.pad(patches, ((0, npad - N), (0, 0)))

    vmem = pl.BlockSpec(memory_space=pltpu.MemorySpace.VMEM)
    out = pl.pallas_call(
        fused_conv_leaky_kernel,
        out_shape=jax.ShapeDtypeStruct((npad, 128), jnp.float32),
        in_specs=[vmem, vmem, vmem],
        out_specs=vmem,
    )(patches, wb, g)                           # (npad, 128) lane-dense, unmasked stores

    return out[:N, :Cout * 9].reshape(N, Cout, 3, 3)   # free slice + reshape, no transpose


def reference_forward(x, w1, b1, w2, b2):
    """Pure-JAX reference using lax convs (NCHW, OIHW)."""
    dn = ("NCHW", "OIHW", "NCHW")
    v1 = lax.conv_general_dilated(x, w1, (2, 2), ((1, 1), (1, 1)),
                                  dimension_numbers=dn) + b1[None, :, None, None]
    v2 = lax.conv_general_dilated(v1, w2, (1, 1), ((1, 1), (1, 1)),
                                  dimension_numbers=dn) + b2[None, :, None, None]
    v5 = jnp.where(v1 > 0, v1, v1 * -0.1)
    v8 = jnp.where(v2 > 0, v2, v2 * -0.1)
    return v5 + v8


if __name__ == "__main__":
    key = jax.random.PRNGKey(0)
    kx, k1, k2, k3, k4 = jax.random.split(key, 5)

    N, Cin, H, W = 2, 8, 2, 2
    Cout = 8

    x = jax.random.normal(kx, (N, Cin, H, W), dtype=jnp.float32)

    # deterministic synthetic parameters (shapes match the PyTorch module)
    w1 = jax.random.normal(k1, (Cout, Cin, 3, 3), dtype=jnp.float32) * 0.1
    b1 = jax.random.normal(k2, (Cout,), dtype=jnp.float32) * 0.1
    w2 = jax.random.normal(k3, (Cout, Cin, 1, 1), dtype=jnp.float32) * 0.1
    b2 = jax.random.normal(k4, (Cout,), dtype=jnp.float32) * 0.1

    wb, g = prepare_params(w1, b1, w2, b2, H, W)   # weight-only prep, done once

    out = model_forward(x, wb, g)
    out = jax.block_until_ready(out)

    ref = jax.block_until_ready(reference_forward(x, w1, b1, w2, b2))
    assert out.shape == (N, Cout, 3, 3), out.shape
    assert jnp.allclose(out, ref, atol=1e-4, rtol=1e-4), "mismatch vs reference"

    print("KERNEL_OK")
</pallas_src>

<mosaic_0001>
module attributes {stable_mosaic.version = 11 : i64} {
  func.func @fused_conv_leaky_kernel(%arg0: memref<8x33xf32, #tpu.memory_space<vmem>>, %arg1: memref<33x24xf32, #tpu.memory_space<vmem>>, %arg2: memref<24x128xf32, #tpu.memory_space<vmem>>, %arg3: memref<8x128xf32, #tpu.memory_space<vmem>>) attributes {dimension_semantics = [], scalar_prefetch = 0 : i64, scratch_operands = 0 : i64, tpu.core_type = #tpu.core_type<tc>} {
    %c0 = arith.constant 0 : index
    %c0_0 = arith.constant 0 : index
    %0 = vector.load %arg0[%c0, %c0_0] : memref<8x33xf32, #tpu.memory_space<vmem>>, vector<8x33xf32>
    %c0_1 = arith.constant 0 : index
    %c0_2 = arith.constant 0 : index
    %1 = vector.load %arg1[%c0_1, %c0_2] : memref<33x24xf32, #tpu.memory_space<vmem>>, vector<33x24xf32>
    %cst = arith.constant dense<0.000000e+00> : vector<8x24xf32>
    %2 = tpu.matmul %0, %1, %cst {dimension_numbers = #tpu.dot_dimension_numbers<[1], [0], [0], [1], [0, 0, 1, 1], [], []>} : vector<8x33xf32>, vector<33x24xf32>, vector<8x24xf32> -> vector<8x24xf32>
    %cst_3 = arith.constant 0.000000e+00 : f32
    %3 = vector.broadcast %cst_3 : f32 to vector<8x24xf32>
    %4 = arith.cmpf ogt, %2, %3 : vector<8x24xf32>
    %cst_4 = arith.constant -1.000000e-01 : f32
    %5 = vector.broadcast %cst_4 : f32 to vector<8x24xf32>
    %6 = arith.mulf %2, %5 : vector<8x24xf32>
    %7 = arith.select %4, %2, %6 : vector<8x24xi1>, vector<8x24xf32>
    %c0_5 = arith.constant 0 : index
    %c0_6 = arith.constant 0 : index
    %8 = vector.load %arg2[%c0_5, %c0_6] : memref<24x128xf32, #tpu.memory_space<vmem>>, vector<24x128xf32>
    %cst_7 = arith.constant dense<0.000000e+00> : vector<8x128xf32>
    %9 = tpu.matmul %7, %8, %cst_7 {dimension_numbers = #tpu.dot_dimension_numbers<[1], [0], [0], [1], [0, 0, 1, 1], [], []>} : vector<8x24xf32>, vector<24x128xf32>, vector<8x128xf32> -> vector<8x128xf32>
    %c0_8 = arith.constant 0 : index
    %c0_9 = arith.constant 0 : index
    %10 = vector.load %arg3[%c0_8, %c0_9] : memref<8x128xf32, #tpu.memory_space<vmem>>, vector<8x128xf32>
    tpu.vector_store %arg3[%c0_8, %c0_9], %9 {strides = array<i32>} : memref<8x128xf32, #tpu.memory_space<vmem>>, vector<8x128xf32>,
    return
  }
}

</mosaic_0001>

<bundles_post_ra>
// kernel: model_forward.1
= control target key start
LH: loop header
LB: loop body
LE: loop exit
PB: predicated region body
PF: predicated region fallthrough
CT: control target
= control target key end

     0   :  { %vm24_vm0 = vcmask 1040384   ;;  %v220_v0 = vmov 0.0   ;;  %vm221_vm1 = vmmov 0   ;;  %vm20_vm2 = vcmask 269312   ;;  %s272_s1 = inlined_call_operand.vmem [shape: f32[33,24], index: 1, kind: input, shape index: {}]   ;;  %s273_s2 = inlined_call_operand.vmem [shape: f32[24,128], index: 2, kind: input, shape index: {}]   ;;  %s274_s0 = inlined_call_operand.vmem [shape: f32[8,33], index: 0, kind: input, shape index: {}]   ;;  %s275_s3 = inlined_call_operand.vmem [shape: f32[8,128], index: 3, kind: output, shape index: {}]  }
   0x1   :  { %196 = vmatprep.subr.mxu0 %v220_v0  ;;  %v19_v1 = vld [vmem:[%s272_s1 + $0x20] sm:$0x1]  ;;  %v18_v2 = vld [vmem:[%s272_s1 + $0x18] sm:$0xff]  ;;  %206 = vmatprep.mubr.msk.f32.mxu0 %vm221_vm1, %v220_v0  ;;  %v17_v3 = vld [vmem:[%s272_s1 + $0x10] sm:$0xff]  ;;  %vm104_vm4 = vcmask 195584  }
   0x2   :  { %197 = vmatpush3.msk.msra.mxu0 %vm24_vm0, %v19_v1  ;;  %209 = vmatprep.subr.mxu1 %v220_v0  ;;  %v103_v4 = vld [vmem:[%s273_s2 + $0x10] sm:$0xff]  ;;  %v16_v5 = vld [vmem:[%s272_s1 + $0x8] sm:$0xff]  ;;  %v15_v6 = vld [vmem:[%s272_s1] sm:$0xff] }
   0x3   :  { %198 = vmatprep.subr.mxu0 %v220_v0  ;;  %215 = vmatprep.mubr.msk.f32.mxu1 %vm221_vm1, %v220_v0  ;;  %v14_v7 = vld [vmem:[%s274_s0] sm:$0xff]  ;;  %v102_v8 = vld [vmem:[%s273_s2 + $0x8] sm:$0xff] }
   0x4   :  { %199 = vmatpush3.msra.mxu0 %v18_v2  ;;  %210 = vmatpush3.msra.mxu1 %v103_v4  ;;  %v101_v9 = vld [vmem:[%s273_s2] sm:$0xff] }
   0x5   :  { %200 = vmatprep.subr.mxu0 %v220_v0  ;;  %211 = vmatprep.subr.mxu1 %v220_v0 }
   0x6   :  { %201 = vmatpush3.msra.mxu0 %v17_v3  ;;  %212 = vmatpush3.msra.mxu1 %v102_v8 }
   0x7   :  { %202 = vmatprep.subr.mxu0 %v220_v0  ;;  %213 = vmatprep.subr.mxu1 %v220_v0 }
   0x8   :  { %203 = vmatpush3.msra.mxu0 %v16_v5  ;;  %214 = vmatpush3.msra.mxu1 %v101_v9 }
   0x9   :  { %204 = vmatprep.subr.mxu0 %v220_v0 }
   0xa   :  { %205 = vmatpush3.msra.mxu0 %v15_v6 }
   0xb   :  { %207 = vmatmul.mubr.msk.f32.vlgmr.msra.gmra.mxu0 %vm20_vm2, %v14_v7 }
  0xcb   :  { %v94_v10 = vpop.f32.mrf.mxu0 }
  0xcc   :  { %vm98_vm3 = vcmp.gt.f32.partialorder %v94_v10, 0.0  ;;  %v99_v11 = vmul.f32 -0.1, %v94_v10 }
  0xcd   :  { %v208_v12 = vpop.f32.mrf.mxu0 }
  0xce   :  { %v100_v13 = vsel %vm98_vm3, %v94_v10, %v99_v11 }
  0xcf   :  { %216 = vmatmul.mubr.msk.f32.vlgmr.msra.gmra.mxu1 %vm104_vm4, %v100_v13 }
 0x18f   :  { %v174_v14 = vpop.f32.mrf.mxu1 }
 0x190   :  { %178 = vst [vmem:[%s275_s3] sm:$0xff] %v174_v14 }
 0x191   :  { %v217_v15 = vpop.f32.mrf.mxu1 }

</bundles_post_ra>
